<compile_context>
chip_gen: v5e
topology: v5e:2x2
jax: 0.10.0
libtpu: 0.0.40
codegen_flags: <defaults>
</compile_context>

<pallas_src>
import jax
import jax.numpy as jnp
from jax.experimental import pallas as pl
from jax.experimental.pallas import tpu as pltpu

_VMEM_LIMIT_BYTES = 64 * 1024 * 1024


def _round_up(x, m):
    return ((x + m - 1) // m) * m


# ----------------------------------------------------------------------------
# Pallas kernel: generic  out = x @ w + b   (bf16 operands, f32 accumulation)
# Used for (a) the hoisted per-layer input projection, (b) the classifier.
# ----------------------------------------------------------------------------
def _matmul_bias_kernel(x_ref, w_ref, b_ref, o_ref):
    o_ref[...] = (jnp.dot(x_ref[...], w_ref[...],
                          preferred_element_type=jnp.float32) + b_ref[...])


def _matmul_bias(x_bf16, w_bf16, b_f32):
    M, K = x_bf16.shape
    N = w_bf16.shape[1]
    return pl.pallas_call(
        _matmul_bias_kernel,
        out_shape=jax.ShapeDtypeStruct((M, N), jnp.float32),
        in_specs=[pl.BlockSpec((M, K), lambda: (0, 0)),
                  pl.BlockSpec((K, N), lambda: (0, 0)),
                  pl.BlockSpec((1, N), lambda: (0, 0))],
        out_specs=pl.BlockSpec((M, N), lambda: (0, 0)),
        compiler_params=pltpu.CompilerParams(
            vmem_limit_bytes=_VMEM_LIMIT_BYTES),
    )(x_bf16, w_bf16, b_f32)


# ----------------------------------------------------------------------------
# Pallas kernel: bidirectional LSTM recurrence (both directions in one program)
# ----------------------------------------------------------------------------
def _bilstm_rec_kernel(gx_ref, whh_f_ref, whh_b_ref, o_ref,
                       hf_ref, cf_ref, hb_ref, cb_ref):
    T = gx_ref.shape[0]
    Hp = whh_f_ref.shape[0]
    G = 4 * Hp                       # per-direction gate width (lane aligned)

    hf_ref[...] = jnp.zeros_like(hf_ref)
    cf_ref[...] = jnp.zeros_like(cf_ref)
    hb_ref[...] = jnp.zeros_like(hb_ref)
    cb_ref[...] = jnp.zeros_like(cb_ref)

    whh_f = whh_f_ref[...]           # (Hp, 4Hp) bf16, loaded once
    whh_b = whh_b_ref[...]

    def lstm_cell(gates, c):
        i_g = jax.nn.sigmoid(gates[:, 0 * Hp:1 * Hp])
        f_g = jax.nn.sigmoid(gates[:, 1 * Hp:2 * Hp])
        g_g = jnp.tanh(gates[:, 2 * Hp:3 * Hp])
        o_g = jax.nn.sigmoid(gates[:, 3 * Hp:4 * Hp])
        c_new = f_g * c + i_g * g_g
        h_new = o_g * jnp.tanh(c_new)
        return h_new, c_new

    # Only unroll fully for short sequences (avoid spill / i-mem blowup).
    @pl.loop(0, T, unroll=(T <= 32))
    def _(t):
        tb = T - 1 - t                            # backward time index (scalar math)

        gx_t = gx_ref[t]                          # (B, 8Hp) f32, bias already folded
        gx_tb = gx_ref[tb]

        # Only the recurrent matmuls remain on the serial chain (bf16 in, f32 acc);
        # the two directions are independent chains and overlap.
        g_f = gx_t[:, :G] + jnp.dot(hf_ref[...].astype(jnp.bfloat16), whh_f,
                                    preferred_element_type=jnp.float32)
        g_b = gx_tb[:, G:] + jnp.dot(hb_ref[...].astype(jnp.bfloat16), whh_b,
                                     preferred_element_type=jnp.float32)

        h_f_new, c_f_new = lstm_cell(g_f, cf_ref[...])
        h_b_new, c_b_new = lstm_cell(g_b, cb_ref[...])

        hf_ref[...] = h_f_new
        cf_ref[...] = c_f_new
        hb_ref[...] = h_b_new
        cb_ref[...] = c_b_new

        # Lane-dense (128-wide, 128-aligned) stores into the fused output slab.
        o_ref[pl.ds(t, 1), :, pl.ds(0, Hp)] = h_f_new[None].astype(o_ref.dtype)
        o_ref[pl.ds(tb, 1), :, pl.ds(Hp, Hp)] = h_b_new[None].astype(o_ref.dtype)


def bilstm_layer(x_2d, T, B, wih_all, whh_f, whh_b, b_all):
    """One bidirectional LSTM layer.

    x_2d    : (T*B, Din) bf16 time-major input, flattened over (T, B)
    wih_all : (Din, 8*Hp) bf16   [fwd gates | bwd gates], gate blocks Hp-wide
    whh_f/b : (Hp, 4*Hp) bf16    per-direction recurrent weights (padded)
    b_all   : (1, 8*Hp) f32      folded, padded bias for both directions
    returns : (T, B, 2*Hp) bf16  [fwd h | bwd h] per time step, original order.
    """
    Hp = whh_f.shape[0]
    Din = x_2d.shape[1]

    # (1) Hoisted input projection for both directions: one big MXU matmul.
    gx = _matmul_bias(x_2d, wih_all, b_all)           # (T*B, 8Hp) f32
    gx = gx.reshape(T, B, 8 * Hp)

    # (2) Recurrence: only h @ W_hh per step, both directions interleaved.
    return pl.pallas_call(
        _bilstm_rec_kernel,
        out_shape=jax.ShapeDtypeStruct((T, B, 2 * Hp), jnp.bfloat16),
        in_specs=[pl.BlockSpec((T, B, 8 * Hp), lambda: (0, 0, 0)),
                  pl.BlockSpec((Hp, 4 * Hp), lambda: (0, 0)),
                  pl.BlockSpec((Hp, 4 * Hp), lambda: (0, 0))],
        out_specs=pl.BlockSpec((T, B, 2 * Hp), lambda: (0, 0, 0)),
        scratch_shapes=[pltpu.VMEM((B, Hp), jnp.float32),
                        pltpu.VMEM((B, Hp), jnp.float32),
                        pltpu.VMEM((B, Hp), jnp.float32),
                        pltpu.VMEM((B, Hp), jnp.float32)],
        compiler_params=pltpu.CompilerParams(
            vmem_limit_bytes=_VMEM_LIMIT_BYTES),
    )(gx, whh_f, whh_b)


# ----------------------------------------------------------------------------
# Weight packing: transpose, fold bias, pad each gate block to Hp lanes.
# Padded lanes have zero weights and zero bias, so padded h/c stay exactly 0.
# ----------------------------------------------------------------------------
def _pad_gate_cols(w_t, H, Hp):
    """(R, 4H) -> (R, 4Hp): each gate's column block padded to Hp with zeros."""
    if Hp == H:
        return w_t
    R = w_t.shape[0]
    out = jnp.zeros((R, 4 * Hp), w_t.dtype)
    for k in range(4):
        out = out.at[:, k * Hp:k * Hp + H].set(w_t[:, k * H:(k + 1) * H])
    return out


def _pad_bias(b, H, Hp):
    if Hp == H:
        return b
    out = jnp.zeros((4 * Hp,), b.dtype)
    for k in range(4):
        out = out.at[k * Hp:k * Hp + H].set(b[k * H:(k + 1) * H])
    return out


def _pack_layer_params(layer_p, H, Hp, input_is_padded):
    wih_cols, whh_list, b_list = [], [], []
    for direction in ("fwd", "bwd"):
        w_ih, w_hh, b_ih, b_hh = layer_p[direction]

        wih_t = w_ih.T.astype(jnp.float32)                    # (Din, 4H)
        if input_is_padded:
            # previous layer's padded output: fwd h at lanes [0:H], bwd at [Hp:Hp+H]
            padded = jnp.zeros((2 * Hp, 4 * H), jnp.float32)
            padded = padded.at[:H].set(wih_t[:H])
            padded = padded.at[Hp:Hp + H].set(wih_t[H:])
            wih_t = padded
        wih_cols.append(_pad_gate_cols(wih_t, H, Hp))          # (Din_p, 4Hp)

        whh_t = _pad_gate_cols(w_hh.T.astype(jnp.float32), H, Hp)   # (H, 4Hp)
        if Hp != H:
            whh_t = jnp.zeros((Hp, 4 * Hp), jnp.float32).at[:H].set(whh_t)
        whh_list.append(whh_t)

        b_list.append(_pad_bias((b_ih + b_hh).astype(jnp.float32), H, Hp))

    wih_all = jnp.concatenate(wih_cols, axis=1).astype(jnp.bfloat16)   # (Din_p, 8Hp)
    whh_f = whh_list[0].astype(jnp.bfloat16)
    whh_b = whh_list[1].astype(jnp.bfloat16)
    b_all = jnp.concatenate(b_list)[None, :].astype(jnp.float32)       # (1, 8Hp)
    return wih_all, whh_f, whh_b, b_all


# ----------------------------------------------------------------------------
# Full model forward (matches the PyTorch LSTM module's forward pass)
# ----------------------------------------------------------------------------
def lstm_model_forward(params, text, labels=None):
    """text: (B, T) int32 token ids. Returns (logits (B, n_labels), loss or None)."""
    H = params["hidden_dim"]
    L = params["n_rnn_layers"]
    Hp = _round_up(H, 128)

    embedded = params["embedding"][text]                         # (B, T, E)
    x_tbd = jnp.transpose(embedded, (1, 0, 2)).astype(jnp.bfloat16)   # (T, B, E)
    T, B, _ = x_tbd.shape
    x_2d = x_tbd.reshape(T * B, -1)

    h_finals = []
    for layer in range(L):
        wih_all, whh_f, whh_b, b_all = _pack_layer_params(
            params["lstm"][layer], H, Hp, input_is_padded=(layer > 0))
        out = bilstm_layer(x_2d, T, B, wih_all, whh_f, whh_b, b_all)  # (T,B,2Hp) bf16
        # h_n: forward final = last time step, lanes [:H]; backward final = t=0,
        # lanes [Hp:Hp+H].  PyTorch order: l0f, l0b, l1f, l1b, ...
        h_finals += [out[T - 1, :, :H], out[0, :, Hp:Hp + H]]
        x_2d = out.reshape(T * B, 2 * Hp)    # padded slab fed straight to next layer

    hidden = jnp.stack(h_finals, axis=0).astype(jnp.float32)     # (2L, B, H) == h_n
    dropped = jnp.transpose(hidden, (1, 0, 2)).reshape(B, -1)    # (B, 2*L*H)

    N = params["linear_w"].shape[0]
    logits = _matmul_bias(dropped.astype(jnp.bfloat16),
                          params["linear_w"].T.astype(jnp.bfloat16),
                          params["linear_b"].reshape(1, N).astype(jnp.float32))

    loss = None
    if labels is not None:
        logp = jax.nn.log_softmax(logits, axis=-1)
        loss = -jnp.mean(jnp.take_along_axis(logp, labels[:, None], axis=-1))
    return logits, loss


# ----------------------------------------------------------------------------
# Pure-JAX reference with matched precision semantics (bf16 matmul operands,
# f32 accumulation, f32 h/c carries) for correctness checking.
# ----------------------------------------------------------------------------
def _lstm_direction_ref(x_tbd, w_ih, w_hh, b_ih, b_hh, H):
    B = x_tbd.shape[1]
    wih = w_ih.T.astype(jnp.bfloat16)
    whh = w_hh.T.astype(jnp.bfloat16)
    b = (b_ih + b_hh).astype(jnp.float32)

    def step(carry, x_t):
        h, c = carry
        gates = (jnp.dot(x_t.astype(jnp.bfloat16), wih,
                         preferred_element_type=jnp.float32)
                 + jnp.dot(h.astype(jnp.bfloat16), whh,
                           preferred_element_type=jnp.float32)
                 + b)
        i = jax.nn.sigmoid(gates[:, :H])
        f = jax.nn.sigmoid(gates[:, H:2 * H])
        g = jnp.tanh(gates[:, 2 * H:3 * H])
        o = jax.nn.sigmoid(gates[:, 3 * H:])
        c = f * c + i * g
        h = o * jnp.tanh(c)
        return (h, c), h

    init = (jnp.zeros((B, H), jnp.float32), jnp.zeros((B, H), jnp.float32))
    (h_fin, _), hseq = jax.lax.scan(step, init, x_tbd)
    return hseq, h_fin


def lstm_model_forward_ref(params, text):
    H = params["hidden_dim"]
    L = params["n_rnn_layers"]
    x = jnp.transpose(params["embedding"][text], (1, 0, 2)).astype(jnp.float32)
    h_finals = []
    for layer in range(L):
        hf, hff = _lstm_direction_ref(x, *params["lstm"][layer]["fwd"], H)
        hb, hfb = _lstm_direction_ref(jnp.flip(x, 0), *params["lstm"][layer]["bwd"], H)
        hb = jnp.flip(hb, 0)
        x = jnp.concatenate([hf, hb], axis=-1)
        # kernel stores h_n in bf16; match that rounding
        h_finals += [hff.astype(jnp.bfloat16).astype(jnp.float32),
                     hfb.astype(jnp.bfloat16).astype(jnp.float32)]
    hidden = jnp.stack(h_finals, axis=0)
    B = hidden.shape[1]
    dropped = jnp.transpose(hidden, (1, 0, 2)).reshape(B, -1)
    return (jnp.dot(dropped.astype(jnp.bfloat16),
                    params["linear_w"].T.astype(jnp.bfloat16),
                    preferred_element_type=jnp.float32)
            + params["linear_b"].astype(jnp.float32))


# ----------------------------------------------------------------------------
# Deterministic parameter init (PyTorch-like uniform(-1/sqrt(H), 1/sqrt(H)))
# ----------------------------------------------------------------------------
def init_params(key, vocab_size, embedding_dim, hidden_dim, n_labels, n_rnn_layers):
    H = hidden_dim
    k = 1.0 / jnp.sqrt(jnp.float32(H))
    keys = jax.random.split(key, 3 + n_rnn_layers)

    params = {
        "hidden_dim": H,
        "n_rnn_layers": n_rnn_layers,
        "embedding": jax.random.normal(keys[0], (vocab_size, embedding_dim),
                                       jnp.float32),
        "linear_w": jax.random.uniform(keys[1], (n_labels, 2 * n_rnn_layers * H),
                                       jnp.float32, -k, k),
        "linear_b": jax.random.uniform(keys[2], (n_labels,), jnp.float32, -k, k),
        "lstm": [],
    }
    for layer in range(n_rnn_layers):
        d_in = embedding_dim if layer == 0 else 2 * H
        lk = jax.random.split(keys[3 + layer], 8)
        layer_p = {}
        for d, direction in enumerate(("fwd", "bwd")):
            w_ih = jax.random.uniform(lk[4 * d + 0], (4 * H, d_in), jnp.float32, -k, k)
            w_hh = jax.random.uniform(lk[4 * d + 1], (4 * H, H), jnp.float32, -k, k)
            b_ih = jax.random.uniform(lk[4 * d + 2], (4 * H,), jnp.float32, -k, k)
            b_hh = jax.random.uniform(lk[4 * d + 3], (4 * H,), jnp.float32, -k, k)
            layer_p[direction] = (w_ih, w_hh, b_ih, b_hh)
        params["lstm"].append(layer_p)
    return params


if __name__ == "__main__":
    # Small, module-consistent sizes
    VOCAB, EMB, HID, N_LABELS, N_LAYERS = 50, 32, 32, 4, 2
    B, T = 2, 8

    key = jax.random.PRNGKey(0)
    k_param, k_text, k_lab = jax.random.split(key, 3)

    params = init_params(k_param, VOCAB, EMB, HID, N_LABELS, N_LAYERS)
    text = jax.random.randint(k_text, (B, T), 0, VOCAB, dtype=jnp.int32)
    labels = jax.random.randint(k_lab, (B,), 0, N_LABELS, dtype=jnp.int32)

    logits, loss = lstm_model_forward(params, text, labels=labels)
    logits = jax.block_until_ready(logits)
    loss = jax.block_until_ready(loss)

    # Correctness check against a precision-matched pure-JAX reference.
    logits_ref = jax.block_until_ready(lstm_model_forward_ref(params, text))
    assert jnp.allclose(logits, logits_ref, atol=1e-2, rtol=1e-2), (
        f"mismatch: max abs err {jnp.max(jnp.abs(logits - logits_ref))}")

    print("KERNEL_OK")
</pallas_src>

<mosaic_0001>
module attributes {stable_mosaic.version = 11 : i64} {
  func.func @_matmul_bias_kernel(%arg0: memref<16x32xbf16, #tpu.memory_space<vmem>>, %arg1: memref<32x1024xbf16, #tpu.memory_space<vmem>>, %arg2: memref<1x1024xf32, #tpu.memory_space<vmem>>, %arg3: memref<16x1024xf32, #tpu.memory_space<vmem>>) attributes {dimension_semantics = [], scalar_prefetch = 0 : i64, scratch_operands = 0 : i64, tpu.core_type = #tpu.core_type<tc>} {
    %c0 = arith.constant 0 : index
    %c0_0 = arith.constant 0 : index
    %0 = vector.load %arg0[%c0, %c0_0] : memref<16x32xbf16, #tpu.memory_space<vmem>>, vector<16x32xbf16>
    %c0_1 = arith.constant 0 : index
    %c0_2 = arith.constant 0 : index
    %1 = vector.load %arg1[%c0_1, %c0_2] : memref<32x1024xbf16, #tpu.memory_space<vmem>>, vector<32x1024xbf16>
    %cst = arith.constant dense<0.000000e+00> : vector<16x1024xf32>
    %2 = tpu.matmul %0, %1, %cst {dimension_numbers = #tpu.dot_dimension_numbers<[1], [0], [0], [1], [0, 0, 1, 1], [], []>} : vector<16x32xbf16>, vector<32x1024xbf16>, vector<16x1024xf32> -> vector<16x1024xf32>
    %c0_3 = arith.constant 0 : index
    %c0_4 = arith.constant 0 : index
    %3 = vector.load %arg2[%c0_3, %c0_4] : memref<1x1024xf32, #tpu.memory_space<vmem>>, vector<1x1024xf32>
    %4 = vector.broadcast %3 : vector<1x1024xf32> to vector<16x1024xf32>
    %5 = arith.addf %2, %4 : vector<16x1024xf32>
    %c0_5 = arith.constant 0 : index
    %c0_6 = arith.constant 0 : index
    %6 = vector.load %arg3[%c0_5, %c0_6] : memref<16x1024xf32, #tpu.memory_space<vmem>>, vector<16x1024xf32>
    tpu.vector_store %arg3[%c0_5, %c0_6], %5 {strides = array<i32>} : memref<16x1024xf32, #tpu.memory_space<vmem>>, vector<16x1024xf32>,
    return
  }
}

</mosaic_0001>

<bundles_post_ra>
// kernel: tpu_custom_call.1
= control target key start
LH: loop header
LB: loop body
LE: loop exit
PB: predicated region body
PF: predicated region fallthrough
CT: control target
= control target key end

     0   :  { %8 = vsyncpa [#allocation3], 0  ;;  %s590_s0 = inlined_call_operand.hbm [shape: bf16[16,32], index: 0, kind: input, shape index: {}]   ;;  %s591_s1 = inlined_call_operand.hbm [shape: bf16[32,1024], index: 1, kind: input, shape index: {}]   ;;  %s592_s2 = inlined_call_operand.hbm [shape: f32[1,1024], index: 2, kind: input, shape index: {}]   ;;  %s593_s3 = inlined_call_operand.hbm [shape: f32[16,1024], index: 3, kind: output, shape index: {}]  }
   0x1   :  { %9 = vsyncpa [#allocation6], 0  ;;  %s28_s14 = sshll.u32 %s591_s1, 4  ;;  %s29_s14 = int_to_ptr.hbm [resolvable:$true] %s28_s14 }
   0x2   :  { %10 = vsyncpa [#allocation4], 0  ;;  %s538_s15 = smov [#allocation5]   ;;  %s15_s19 = sshll.u32 %s590_s0, 4  ;;  %s16_s19 = int_to_ptr.hbm [resolvable:$true] %s15_s19 }
   0x3   :  { %s30_s16 = sshll.u32 %s538_s15, 4  ;;  %s539_s20 = smov 512   ;;  %s31_s16 = int_to_ptr.vmem [resolvable:$true] %s30_s16 }
   0x4   :  { %s540_s21 = smov 32   ;;  %s541_s22 = smov [#allocation2]  }
   0x5   :  { %36 = dma.hbm_to_vmem [thread:$0]  %s29_s14, 2048, %s31_s16, [#allocation6], %s539_s20, %s539_s20, %s540_s21  }
   0x6   :  { %s17_s23 = sshll.u32 %s541_s22, 4  ;;  %s542_s24 = smov 64   ;;  %s18_s23 = int_to_ptr.vmem [resolvable:$true] %s17_s23 }
   0x7   :  { %s543_s25 = smov 4   ;;  %s42_s27 = sshll.u32 %s592_s2, 4  ;;  %s43_s27 = int_to_ptr.hbm [resolvable:$true] %s42_s27 }
   0x8   :  { %23 = dma.hbm_to_vmem [thread:$0]  %s16_s19, 128, %s18_s23, [#allocation3], %s542_s24, %s542_s24, %s543_s25  }
   0x9   :  { %s544_s28 = smov [#allocation7]  }
   0xa   :  { %s44_s29 = sshll.u32 %s544_s28, 4  ;;  %s45_s29 = int_to_ptr.vmem [resolvable:$true] %s44_s29 }
   0xb   :  { %47 = dma.hbm_to_vmem [thread:$0]  %s43_s27, 128, %s45_s29, [#allocation6]  }
   0xc   :  { %532 = dma.done.wait [#allocation3], 128  }
   0xd   :  { %533 = vsyncadd [#allocation3], 4294967168 }
   0xe   :  { %534 = dma.done.wait [#allocation6], 2176  }
   0xf   :  { %535 = vsyncadd [#allocation6], 4294965120  ;;  %v372_v0 = vld [vmem:[#allocation5 + $0x40] sm:$0xf]  ;;  %v419_v2 = vld [vmem:[#allocation5 + $0x44] sm:$0xf] }
  0x10   :  { %v423_v1 = vld [vmem:[#allocation5 + $0x5c] sm:$0xf0]  ;;  %v374_v4 = vld [vmem:[#allocation5 + $0x60] sm:$0xf0]  ;;  %v380_v5 = vld [vmem:[#allocation5 + $0x48] sm:$0xf] }
  0x11   :  { %v373_v3 = vor.u32 %v423_v1, %v372_v0  ;;  %v424_v6 = vld [vmem:[#allocation5 + $0x64] sm:$0xf0]  ;;  %v377_v7 = vor.u32 %v419_v2, %v374_v4  ;;  %v420_v9 = vld [vmem:[#allocation5 + $0x4c] sm:$0xf]  ;;  %v340_v11 = vld [vmem:[#allocation5] sm:$0xf] }
  0x12   :  { %v381_v8 = vor.u32 %v424_v6, %v380_v5  ;;  %v382_v10 = vld [vmem:[#allocation5 + $0x68] sm:$0xf0]  ;;  %v415_v13 = vld [vmem:[#allocation5 + $0x1c] sm:$0xf0]  ;;  %v411_v14 = vld [vmem:[#allocation5 + $0x4] sm:$0xf] }
  0x13   :  { %192 = vmatpush.bf16.msra.mxu0 %v373_v3  ;;  %v385_v12 = vor.u32 %v420_v9, %v382_v10  ;;  %v342_v15 = vld [vmem:[#allocation5 + $0x20] sm:$0xf0]  ;;  %206 = vmatpush.bf16.msra.mxu1 %v377_v7  ;;  %v341_v16 = vor.u32 %v415_v13, %v340_v11  ;;  %v348_v18 = vld [vmem:[#allocation5 + $0x8] sm:$0xf]  ;;  %v412_v20 = vld [vmem:[#allocation5 + $0xc] sm:$0xf] }
  0x14   :  { %220 = vmatpush.bf16.msra.mxu2 %v381_v8  ;;  %v345_v17 = vor.u32 %v411_v14, %v342_v15  ;;  %v416_v19 = vld [vmem:[#allocation5 + $0x24] sm:$0xf0]  ;;  %v350_v22 = vld [vmem:[#allocation5 + $0x28] sm:$0xf0]  ;;  %v410_v23 = vld [vmem:[#allocation2] sm:$0xff]  ;;  %vm182_vm0 = vcmask 261120  }
  0x15   :  { %234 = vmatpush.bf16.msra.mxu3 %v385_v12  ;;  %v349_v21 = vor.u32 %v416_v19, %v348_v18  ;;  %v396_v24 = vld [vmem:[#allocation5 + $0x58] sm:$0xf]  ;;  %v353_v25 = vor.u32 %v412_v20, %v350_v22  ;;  %v422_v27 = vld [vmem:[#allocation5 + $0x5c] sm:$0xf]  ;;  %v388_v31 = vld [vmem:[#allocation5 + $0x50] sm:$0xf] }
  0x16   :  { %v426_v26 = vld [vmem:[#allocation5 + $0x74] sm:$0xf0]  ;;  %v398_v28 = vld [vmem:[#allocation5 + $0x78] sm:$0xf0]  ;;  %v425_v32 = vld [vmem:[#allocation5 + $0x6c] sm:$0xf0] }
  0x17   :  { %193 = vmatpush.bf16.msra.mxu0 %v341_v16  ;;  %v397_v29 = vor.u32 %v426_v26, %v396_v24  ;;  %v401_v30 = vor.u32 %v422_v27, %v398_v28  ;;  %v421_v33 = vld [vmem:[#allocation5 + $0x54] sm:$0xf]  ;;  %207 = vmatpush.bf16.msra.mxu1 %v345_v17  ;;  %v389_v34 = vor.u32 %v425_v32, %v388_v31  ;;  %v364_v36 = vld [vmem:[#allocation5 + $0x18] sm:$0xf]  ;;  %v414_v40 = vld [vmem:[#allocation5 + $0x1c] sm:$0xf] }
  0x18   :  { %221 = vmatpush.bf16.msra.mxu2 %v349_v21  ;;  %v390_v35 = vld [vmem:[#allocation5 + $0x70] sm:$0xf0]  ;;  %v418_v37 = vld [vmem:[#allocation5 + $0x34] sm:$0xf0]  ;;  %v366_v41 = vld [vmem:[#allocation5 + $0x38] sm:$0xf0] }
  0x19   :  { %235 = vmatpush.bf16.msra.mxu3 %v353_v25  ;;  %v393_v38 = vor.u32 %v421_v33, %v390_v35  ;;  %v365_v39 = vor.u32 %v418_v37, %v364_v36  ;;  %v356_v42 = vld [vmem:[#allocation5 + $0x10] sm:$0xf]  ;;  %v369_v43 = vor.u32 %v414_v40, %v366_v41  ;;  %v413_v45 = vld [vmem:[#allocation5 + $0x14] sm:$0xf]  ;;  %v79_v49 = vld [vmem:[#allocation7] sm:$0xff]  ;;  %s545_s0 = smov [#allocation8]  }
  0x1a   :  { %402 = vmatmul.msk.bf16.vlgmr.msra.gmra.mxu0 %vm182_vm0, %v410_v23  ;;  %v417_v44 = vld [vmem:[#allocation5 + $0x2c] sm:$0xf0]  ;;  %v358_v46 = vld [vmem:[#allocation5 + $0x30] sm:$0xf0]  ;;  %403 = vmatmul.msk.bf16.vlgmr.msra.gmra.mxu1 %vm182_vm0, %v410_v23  ;;  %v81_v50 = vperm.slane %v79_v49, 0  ;;  %v82_v51 = vperm.slane %v79_v49, 1 }
  0x1b   :  { %404 = vmatmul.msk.bf16.vlgmr.msra.gmra.mxu2 %vm182_vm0, %v410_v23  ;;  %248 = vmatpush.bf16.msrb.mxu0 %v389_v34  ;;  %v357_v47 = vor.u32 %v417_v44, %v356_v42  ;;  %v361_v48 = vor.u32 %v413_v45, %v358_v46  ;;  %v83_v56 = vperm.slane %v79_v49, 2  ;;  %v84_v57 = vperm.slane %v79_v49, 3  ;;  %s318_s2 = sshll.u32 %s545_s0, 4  ;;  %s320_s5 = sshll.u32 %s593_s3, 4  ;;  %s319_s2 = int_to_ptr.vmem [resolvable:$true] %s318_s2  ;;  %s321_s5 = int_to_ptr.hbm [resolvable:$true] %s320_s5 }
  0x1c   :  { %276 = vmatpush.bf16.msrb.mxu2 %v397_v29  ;;  %405 = vmatmul.msk.bf16.vlgmr.msra.gmra.mxu3 %vm182_vm0, %v410_v23  ;;  %v85_v2 = vperm.slane %v79_v49, 4  ;;  %v86_v3 = vperm.slane %v79_v49, 5  ;;  %v87_v12 = vperm.slane %v79_v49, 6  ;;  %v88_v13 = vperm.slane %v79_v49, 7  ;;  %s546_s6 = smov 1024  }
  0x1d   :  { %290 = vmatpush.bf16.msrb.mxu3 %v401_v30  ;;  %262 = vmatpush.bf16.msrb.mxu1 %v393_v38 }
  0x1f   :  { %249 = vmatpush.bf16.msrb.mxu0 %v357_v47 }
  0x20   :  { %277 = vmatpush.bf16.msrb.mxu2 %v365_v39 }
  0x21   :  { %291 = vmatpush.bf16.msrb.mxu3 %v369_v43  ;;  %263 = vmatpush.bf16.msrb.mxu1 %v361_v48 }
  0x2a   :  { %406 = vmatmul.msk.bf16.vlgmr.msrb.gmra.mxu0 %vm182_vm0, %v410_v23  ;;  %407 = vmatmul.msk.bf16.vlgmr.msrb.gmra.mxu1 %vm182_vm0, %v410_v23 }
  0x2b   :  { %408 = vmatmul.msk.bf16.vlgmr.msrb.gmra.mxu2 %vm182_vm0, %v410_v23 }
  0x2c   :  { %409 = vmatmul.msk.bf16.vlgmr.msrb.gmra.mxu3 %vm182_vm0, %v410_v23 }
  0x97   :  { %v195_v52 = vpop.f32.mrf.mxu0  ;;  %v209_v54 = vpop.f32.mrf.mxu1 }
  0x98   :  { %v196_v53 = vadd.f32 %v195_v52, %v81_v50  ;;  %v210_v55 = vadd.f32 %v209_v54, %v82_v51 }
  0x9a   :  { %298 = vst [vmem:[#allocation8] sm:$0xff] %v196_v53 }
  0x9b   :  { %299 = vst [vmem:[#allocation8 + $0x8] sm:$0xff] %v210_v55 }
  0x9e   :  { %v223_v58 = vpop.f32.mrf.mxu2 }
  0x9f   :  { %v224_v59 = vadd.f32 %v223_v58, %v83_v56  ;;  %v237_v60 = vpop.f32.mrf.mxu3  ;;  %v197_v61 = vpop.f32.mrf.mxu0 }
  0xa0   :  { %v238_v62 = vadd.f32 %v237_v60, %v84_v57  ;;  %v198_v63 = vadd.f32 %v197_v61, %v81_v50  ;;  %v211_v0 = vpop.f32.mrf.mxu1 }
  0xa1   :  { %300 = vst [vmem:[#allocation8 + $0x10] sm:$0xff] %v224_v59  ;;  %v212_v1 = vadd.f32 %v211_v0, %v82_v51 }
  0xa2   :  { %301 = vst [vmem:[#allocation8 + $0x18] sm:$0xff] %v238_v62 }
  0xa3   :  { %306 = vst [vmem:[#allocation8 + $0x40] sm:$0xff] %v198_v63 }
  0xa4   :  { %307 = vst [vmem:[#allocation8 + $0x48] sm:$0xff] %v212_v1 }
  0xa6   :  { %v225_v4 = vpop.f32.mrf.mxu2 }
  0xa7   :  { %v226_v5 = vadd.f32 %v225_v4, %v83_v56  ;;  %v239_v6 = vpop.f32.mrf.mxu3  ;;  %v251_v7 = vpop.f32.mrf.mxu0 }
  0xa8   :  { %v240_v8 = vadd.f32 %v239_v6, %v84_v57  ;;  %v252_v9 = vadd.f32 %v251_v7, %v85_v2  ;;  %v265_v10 = vpop.f32.mrf.mxu1 }
  0xa9   :  { %308 = vst [vmem:[#allocation8 + $0x50] sm:$0xff] %v226_v5  ;;  %v266_v11 = vadd.f32 %v265_v10, %v86_v3 }
  0xaa   :  { %309 = vst [vmem:[#allocation8 + $0x58] sm:$0xff] %v240_v8 }
  0xab   :  { %302 = vst [vmem:[#allocation8 + $0x20] sm:$0xff] %v252_v9 }
  0xac   :  { %303 = vst [vmem:[#allocation8 + $0x28] sm:$0xff] %v266_v11 }
  0xae   :  { %v279_v14 = vpop.f32.mrf.mxu2 }
  0xaf   :  { %v280_v15 = vadd.f32 %v279_v14, %v87_v12  ;;  %v293_v16 = vpop.f32.mrf.mxu3  ;;  %v253_v17 = vpop.f32.mrf.mxu0 }
  0xb0   :  { %v294_v18 = vadd.f32 %v293_v16, %v88_v13  ;;  %v254_v19 = vadd.f32 %v253_v17, %v85_v2  ;;  %v267_v20 = vpop.f32.mrf.mxu1 }
  0xb1   :  { %304 = vst [vmem:[#allocation8 + $0x30] sm:$0xff] %v280_v15  ;;  %v268_v21 = vadd.f32 %v267_v20, %v86_v3 }
  0xb2   :  { %305 = vst [vmem:[#allocation8 + $0x38] sm:$0xff] %v294_v18 }
  0xb3   :  { %310 = vst [vmem:[#allocation8 + $0x60] sm:$0xff] %v254_v19 }
  0xb4   :  { %311 = vst [vmem:[#allocation8 + $0x68] sm:$0xff] %v268_v21 }
  0xb6   :  { %v281_v22 = vpop.f32.mrf.mxu2 }
  0xb7   :  { %v282_v23 = vadd.f32 %v281_v22, %v87_v12  ;;  %v295_v24 = vpop.f32.mrf.mxu3 }
  0xb8   :  { %v296_v25 = vadd.f32 %v295_v24, %v88_v13 }
  0xb9   :  { %312 = vst [vmem:[#allocation8 + $0x70] sm:$0xff] %v282_v23 }
  0xba   :  { %313 = vst [vmem:[#allocation8 + $0x78] sm:$0xff] %v296_v25 }
  0xbb   :  { %326 = dma.vmem_to_hbm [thread:$0]  %s319_s2, 2048, %s321_s5, [#allocation4], %s546_s6, %s546_s6, %s542_s24  }
  0xbc   :  { %536 = dma.done.wait [#allocation4], 2048  }
  0xbd   :  { %537 = vsyncadd [#allocation4], 4294965248 }
  0xbe   :  { %331 = vsyncpa [#allocation3], 1 }
  0xbf   :  { %332 = vsyncpa [#allocation6], 1 }
  0xc0   :  { %333 = vsyncpa [#allocation4], 1 }

</bundles_post_ra>
